<compile_context>
chip_gen: v6e
topology: v6e:2x2x1
jax: 0.10.0
libtpu: 0.0.40
codegen_flags: <defaults>
</compile_context>

<pallas_src>
import jax
import jax.numpy as jnp
from jax.experimental import pallas as pl
from jax.experimental.pallas import tpu as pltpu

# Deterministic "parameters" (module __init__ args r, K)
R_VAL = 2.0
K_VAL = 10.0
R_OVER_K = R_VAL / K_VAL          # fold 1/K at trace time -> no runtime divide

_LANE = 512                        # lane-dense last dim (multiple of 128 -> unmasked vst)
_MAX_BLOCK_ROWS = 1024             # 1024*512*4 B = 2 MiB per buffer
_VMEM_LIMIT_BYTES = 32 * 1024 * 1024   # explicit: covers 12 MiB of pipeline buffers on v5e too
_PALLAS_MIN_ELEMS = 16 * 1024      # below this a pallas_call launch dominates


def _cdiv(a, b):
    return (a + b - 1) // b


def _round_up(x, m):
    return _cdiv(x, m) * m


def _logistic_kernel(y_ref, f_ref, dfdy_ref):
    y = y_ref[...]
    ry_over_k = y * jnp.float32(R_OVER_K)                   # r*y/K (shared term)
    f_ref[...] = (jnp.float32(R_VAL) - ry_over_k) * y       # r*(1 - y/K)*y
    dfdy_ref[...] = jnp.float32(R_VAL) - 2.0 * ry_over_k    # r - 2*r*y/K


def _pick_block_rows(rows):
    """Big blocks to amortize per-step cost, but keep >= 2 grid steps (v7x 2 TCs)."""
    if rows <= 16:
        return _round_up(rows, 8)                     # single small (8,128)-aligned block
    return min(_MAX_BLOCK_ROWS, _round_up(_cdiv(rows, 2), 8))


def _logistic_pallas(y):
    """Elementwise logistic RHS via Pallas on a flattened, lane-dense view."""
    shape = y.shape
    n = y.size
    rows = _cdiv(n, _LANE)
    block_rows = _pick_block_rows(rows)
    grid_rows = _cdiv(rows, block_rows)
    total_rows = grid_rows * block_rows
    padded_n = total_rows * _LANE
    needs_pad = padded_n != n

    y_flat = y.reshape(-1)                            # free view of contiguous y
    if needs_pad:
        # TODO(synk): ragged tails could use a tiny jnp epilogue instead of a full
        # pad; only small / odd sizes (forced-Pallas) reach this branch.
        y_flat = jnp.pad(y_flat, (0, padded_n - n))
    y2d = y_flat.reshape(total_rows, _LANE)

    cost = pl.CostEstimate(
        flops=3 * padded_n,                           # mul + sub + mul (f), sub+mul (dfdy)
        transcendentals=0,
        bytes_accessed=12 * padded_n,                 # 1 f32 read + 2 f32 writes per element
    )

    f2d, dfdy2d = pl.pallas_call(
        _logistic_kernel,
        out_shape=(
            jax.ShapeDtypeStruct((total_rows, _LANE), y2d.dtype),
            jax.ShapeDtypeStruct((total_rows, _LANE), y2d.dtype),
        ),
        grid_spec=pl.GridSpec(
            grid=(grid_rows,),
            in_specs=[pl.BlockSpec((block_rows, _LANE), lambda i: (i, 0))],
            out_specs=[
                pl.BlockSpec((block_rows, _LANE), lambda i: (i, 0)),
                pl.BlockSpec((block_rows, _LANE), lambda i: (i, 0)),
            ],
        ),
        compiler_params=pltpu.CompilerParams(
            # Shards the grid axis across both v7x TensorCores; harmless on 1-TC chips.
            dimension_semantics=("parallel",),
            vmem_limit_bytes=_VMEM_LIMIT_BYTES,
        ),
        cost_estimate=cost,
    )(y2d)

    if needs_pad:
        f = f2d.reshape(-1)[:n].reshape(shape)
        dfdy = dfdy2d.reshape(-1)[:n].reshape(shape)
    else:
        f = f2d.reshape(shape)
        dfdy = dfdy2d.reshape(shape)
    return f, dfdy


def logistic_ode_forward(t, y, use_pallas=None):
    """Mirrors LogisticODE.forward: returns (f, jac[..., None])."""
    del t  # unused in forward, same as the PyTorch module
    y = jnp.asarray(y, jnp.float32)
    if use_pallas is None:
        # Only take the Pallas path when the wrapper is copy-free (divisible size)
        # and the array is large enough to amortize the launch.
        use_pallas = (y.size >= _PALLAS_MIN_ELEMS) and (y.size % _LANE == 0)
    if use_pallas:
        f, dfdy = _logistic_pallas(y)
    else:
        # Small / ragged inputs: fused jnp elementwise already hits the HBM roofline.
        ry_over_k = y * jnp.float32(R_OVER_K)
        f = (jnp.float32(R_VAL) - ry_over_k) * y
        dfdy = jnp.float32(R_VAL) - 2.0 * ry_over_k
    return f, dfdy[..., None]


def _reference(t, y):
    r = jnp.float32(R_VAL)
    k = jnp.float32(K_VAL)
    return r * (1.0 - y / k) * y, (r - 2.0 * r * y / k)[..., None]


if __name__ == "__main__":
    key = jax.random.PRNGKey(0)
    k_t, k_small, k_big = jax.random.split(key, 3)
    t = jax.random.uniform(k_t, (), dtype=jnp.float32)

    # Small, module-consistent shape (batch=2, state-dim=8).
    # Force the Pallas path so the kernel itself is exercised on TPU.
    y_small = jax.random.uniform(k_small, (2, 8), dtype=jnp.float32) * jnp.float32(K_VAL)
    f_s, jac_s = logistic_ode_forward(t, y_small, use_pallas=True)
    jax.block_until_ready(f_s)
    jax.block_until_ready(jac_s)
    f_ref, jac_ref = _reference(t, y_small)
    assert f_s.shape == (2, 8) and jac_s.shape == (2, 8, 1)
    assert jnp.allclose(f_s, f_ref, atol=1e-5, rtol=1e-5)
    assert jnp.allclose(jac_s, jac_ref, atol=1e-5, rtol=1e-5)

    # Same shape through the automatic gate (jnp fallback) -- semantics identical.
    f_g, jac_g = logistic_ode_forward(t, y_small)
    assert jnp.allclose(f_g, f_ref, atol=1e-5, rtol=1e-5)
    assert jnp.allclose(jac_g, jac_ref, atol=1e-5, rtol=1e-5)

    # Medium shape exercising the copy-free hot path:
    # (256, 2048) flattens to 1024 x 512 -> two (512, 512) blocks, no pad, no
    # output slice, grid of 2 so both v7x TensorCores get a slice.
    y_big = jax.random.uniform(k_big, (256, 2048), dtype=jnp.float32) * jnp.float32(K_VAL)
    f_b, jac_b = logistic_ode_forward(t, y_big)
    jax.block_until_ready(f_b)
    jax.block_until_ready(jac_b)
    f_bref, jac_bref = _reference(t, y_big)
    assert f_b.shape == (256, 2048) and jac_b.shape == (256, 2048, 1)
    assert jnp.allclose(f_b, f_bref, atol=1e-5, rtol=1e-5)
    assert jnp.allclose(jac_b, jac_bref, atol=1e-5, rtol=1e-5)

    print("KERNEL_OK")
</pallas_src>

<mosaic_0001>
module attributes {stable_mosaic.version = 11 : i64} {
  func.func @_logistic_kernel(%arg0: i32, %arg1: memref<8x512xf32, #tpu.memory_space<vmem>>, %arg2: memref<8x512xf32, #tpu.memory_space<vmem>>, %arg3: memref<8x512xf32, #tpu.memory_space<vmem>>) attributes {dimension_semantics = [#tpu.dimension_semantics<parallel>], iteration_bounds = array<i64: 1>, scalar_prefetch = 0 : i64, scratch_operands = 0 : i64, tpu.core_type = #tpu.core_type<tc>, window_params = [{transform_indices = @transform_0, window_bounds = array<i64: 8, 512>}, {transform_indices = @transform_1, window_bounds = array<i64: 8, 512>}, {transform_indices = @transform_2, window_bounds = array<i64: 8, 512>}]} {
    %c0 = arith.constant 0 : index
    %c0_0 = arith.constant 0 : index
    %0 = vector.load %arg1[%c0, %c0_0] : memref<8x512xf32, #tpu.memory_space<vmem>>, vector<8x512xf32>
    %cst = arith.constant 2.000000e-01 : f32
    %1 = vector.broadcast %cst : f32 to vector<8x512xf32>
    %2 = arith.mulf %0, %1 : vector<8x512xf32>
    %cst_1 = arith.constant 2.000000e+00 : f32
    %3 = vector.broadcast %cst_1 : f32 to vector<8x512xf32>
    %4 = arith.subf %3, %2 : vector<8x512xf32>
    %5 = arith.mulf %4, %0 : vector<8x512xf32>
    %c0_2 = arith.constant 0 : index
    %c0_3 = arith.constant 0 : index
    %6 = vector.load %arg2[%c0_2, %c0_3] : memref<8x512xf32, #tpu.memory_space<vmem>>, vector<8x512xf32>
    tpu.vector_store %arg2[%c0_2, %c0_3], %5 {strides = array<i32>} : memref<8x512xf32, #tpu.memory_space<vmem>>, vector<8x512xf32>,
    %cst_4 = arith.constant 2.000000e+00 : f32
    %7 = vector.broadcast %cst_4 : f32 to vector<8x512xf32>
    %8 = arith.mulf %7, %2 : vector<8x512xf32>
    %cst_5 = arith.constant 2.000000e+00 : f32
    %9 = vector.broadcast %cst_5 : f32 to vector<8x512xf32>
    %10 = arith.subf %9, %8 : vector<8x512xf32>
    %c0_6 = arith.constant 0 : index
    %c0_7 = arith.constant 0 : index
    %11 = vector.load %arg3[%c0_6, %c0_7] : memref<8x512xf32, #tpu.memory_space<vmem>>, vector<8x512xf32>
    tpu.vector_store %arg3[%c0_6, %c0_7], %10 {strides = array<i32>} : memref<8x512xf32, #tpu.memory_space<vmem>>, vector<8x512xf32>,
    return
  }
  func.func @transform_0(%arg0: i32) -> (i32, i32) {
    %c0_i32 = arith.constant 0 : i32
    %c0_i32_0 = arith.constant 0 : i32
    return %arg0, %c0_i32 : i32, i32
  }
  func.func @transform_1(%arg0: i32) -> (i32, i32) {
    %c0_i32 = arith.constant 0 : i32
    %c0_i32_0 = arith.constant 0 : i32
    return %arg0, %c0_i32 : i32, i32
  }
  func.func @transform_2(%arg0: i32) -> (i32, i32) {
    %c0_i32 = arith.constant 0 : i32
    %c0_i32_0 = arith.constant 0 : i32
    return %arg0, %c0_i32 : i32, i32
  }
}

</mosaic_0001>

<bundles_post_ra>
// kernel: tpu_custom_call.1
= control target key start
LH: loop header
LB: loop body
LE: loop exit
PB: predicated region body
PF: predicated region fallthrough
CT: control target
= control target key end

     0   :  { %8 = vsyncpa [#allocation3], 0  ;;  %s181_s0 = inlined_call_operand.hbm [shape: f32[8,512], index: 0, kind: input, shape index: {}]   ;;  %s182_s1 = inlined_call_operand.hbm [shape: f32[8,512], index: 1, kind: output, shape index: {0}]   ;;  %s183_s2 = inlined_call_operand.hbm [shape: f32[8,512], index: 2, kind: output, shape index: {1}]  }
   0x1   :  { %9 = vsyncpa [#allocation4], 0 }
   0x2   :  { %10 = vsyncpa [#allocation7], 0  ;;  %s154_s9 = smov [#allocation2]  }
   0x3   :  { %s17_s10 = sshll.u32 %s154_s9, 4  ;;  %s18_s10 = int_to_ptr.vmem [resolvable:$true] %s17_s10 }
   0x4   :  { %s96_s11 = scalar_lea.vmem %s18_s10, 512  ;;  %p101_p1 = scmp.lt.s32.totalorder %s18_s10, %s18_s10 }
   0x5   :  { %p97_p0 = scmp.ne.s32.totalorder %s18_s10, %s96_s11  ;;  %p102_p2 = scmp.lt.s32.totalorder %s96_s11, %s96_s11 }
   0x7   :  { %p103_p3 = por %p102_p2, %p101_p1 }
   0x9   :  { %p104_p4 = pnand %p103_p3, %p97_p0 }
   0xb   :  { %107 = shalt.err (!%p104_p4)
}
   0xc   :  { %20 = dma.hbm_to_vmem [thread:$0]  %s181_s0, 512, %s18_s10, [#allocation3]  }
   0xd   :  { %148 = dma.done.wait [#allocation3], 512  }
   0xe   :  { %149 = vsyncadd [#allocation3], 4294966784  ;;  %v24_v0 = vld [vmem:[#allocation2] sm:$0xff]  ;;  %v25_v1 = vld [vmem:[#allocation2 + $0x8] sm:$0xff]  ;;  %s155_s14 = smov [#allocation5]   ;;  %s156_s0 = smov [#allocation6]  }
   0xf   :  { %v26_v2 = vld [vmem:[#allocation2 + $0x10] sm:$0xff]  ;;  %v28_v3 = vmul.f32 0.2, %v24_v0  ;;  %v29_v4 = vmul.f32 0.2, %v25_v1  ;;  %v27_v6 = vld [vmem:[#allocation2 + $0x18] sm:$0xff] }
  0x10   :  { %v30_v5 = vmul.f32 0.2, %v26_v2  ;;  %v31_v10 = vmul.f32 0.2, %v27_v6  ;;  %s62_s15 = sshll.u32 %s155_s14, 4  ;;  %s72_s16 = sshll.u32 %s156_s0, 4  ;;  %s63_s15 = int_to_ptr.vmem [resolvable:$true] %s62_s15  ;;  %s73_s16 = int_to_ptr.vmem [resolvable:$true] %s72_s16 }
  0x11   :  { %v32_v7 = vsub.f32 2.0, %v28_v3  ;;  %v33_v8 = vsub.f32 2.0, %v29_v4  ;;  %v44_v11 = vmul.f32 2.0, %v28_v3  ;;  %v45_v12 = vmul.f32 2.0, %v29_v4  ;;  %s108_s17 = scalar_lea.vmem %s63_s15, 512  ;;  %p113_p6 = scmp.lt.s32.totalorder %s63_s15, %s63_s15 }
  0x12   :  { %v34_v9 = vsub.f32 2.0, %v30_v5  ;;  %v46_v13 = vmul.f32 2.0, %v30_v5  ;;  %v35_v17 = vsub.f32 2.0, %v31_v10  ;;  %v47_v21 = vmul.f32 2.0, %v31_v10  ;;  %p109_p5 = scmp.ne.s32.totalorder %s63_s15, %s108_s17  ;;  %p114_p7 = scmp.lt.s32.totalorder %s108_s17, %s108_s17 }
  0x13   :  { %v36_v14 = vmul.f32 %v32_v7, %v24_v0  ;;  %v37_v15 = vmul.f32 %v33_v8, %v25_v1  ;;  %v48_v18 = vsub.f32 2.0, %v44_v11  ;;  %v49_v19 = vsub.f32 2.0, %v45_v12 }
  0x14   :  { %v38_v16 = vmul.f32 %v34_v9, %v26_v2  ;;  %v50_v20 = vsub.f32 2.0, %v46_v13  ;;  %v39_v22 = vmul.f32 %v35_v17, %v27_v6  ;;  %v51_v23 = vsub.f32 2.0, %v47_v21  ;;  %p115_p8 = por %p114_p7, %p113_p6 }
  0x15   :  { %40 = vst [vmem:[#allocation5] sm:$0xff] %v36_v14  ;;  %41 = vst [vmem:[#allocation5 + $0x8] sm:$0xff] %v37_v15 }
  0x16   :  { %42 = vst [vmem:[#allocation5 + $0x10] sm:$0xff] %v38_v16  ;;  %52 = vst [vmem:[#allocation6] sm:$0xff] %v48_v18  ;;  %p116_p9 = pnand %p115_p8, %p109_p5 }
  0x17   :  { %53 = vst [vmem:[#allocation6 + $0x8] sm:$0xff] %v49_v19  ;;  %54 = vst [vmem:[#allocation6 + $0x10] sm:$0xff] %v50_v20 }
  0x18   :  { %43 = vst [vmem:[#allocation5 + $0x18] sm:$0xff] %v39_v22  ;;  %55 = vst [vmem:[#allocation6 + $0x18] sm:$0xff] %v51_v23 }
  0x19   :  { %119 = shalt.err (!%p116_p9)
}
  0x1a   :  { %65 = dma.vmem_to_hbm [thread:$0]  %s63_s15, 512, %s182_s1, [#allocation4]  }
  0x1b   :  { %s128_s20 = scalar_lea.vmem %s73_s16, 512  ;;  %p133_p11 = scmp.lt.s32.totalorder %s73_s16, %s73_s16 }
  0x1c   :  { %p129_p10 = scmp.ne.s32.totalorder %s73_s16, %s128_s20  ;;  %p134_p12 = scmp.lt.s32.totalorder %s128_s20, %s128_s20 }
  0x1e   :  { %p135_p13 = por %p134_p12, %p133_p11 }
  0x20   :  { %p136_p0 = pnand %p135_p13, %p129_p10 }
  0x22   :  { %139 = shalt.err (!%p136_p0)
}
  0x23   :  { %75 = dma.vmem_to_hbm [thread:$0]  %s73_s16, 512, %s183_s2, [#allocation7]  }
  0x24   :  { %150 = dma.done.wait [#allocation4], 512  }
  0x25   :  { %151 = vsyncadd [#allocation4], 4294966784 }
  0x26   :  { %152 = dma.done.wait [#allocation7], 512  }
  0x27   :  { %153 = vsyncadd [#allocation7], 4294966784 }
  0x28   :  { %82 = vsyncpa [#allocation3], 1 }
  0x29   :  { %83 = vsyncpa [#allocation4], 1 }
  0x2a   :  { %84 = vsyncpa [#allocation7], 1 }

</bundles_post_ra>
